<compile_context>
chip_gen: v7x
topology: tpu7x:2x2x1
jax: 0.10.0
libtpu: 0.0.40
codegen_flags: <defaults>
</compile_context>

<pallas_src>
import jax
import jax.numpy as jnp
from jax import lax
from jax.experimental import pallas as pl
from jax.experimental.pallas import tpu as pltpu

HIDDEN = 256
_LANE = 128


def _round_up(n, m):
    return ((n + m - 1) // m) * m


def _cdiv(a, b):
    return -(-a // b)


def _valuenet_kernel(x_ref, w1_ref, b1_ref, w2_ref, b2_ref, w3_ref, b3_ref, o_ref):
    # x : (TB, D)    f32   (native batch-major; transpose folded into the MXU feed)
    # w1: (256, D)   f32   b1: (256, 1) f32
    # w2: (256, 256) bf16  b2: (256, 1) f32
    # w3: (256, 1)   f32   b3: (1, 1)   f32 (SMEM)
    # o : (1, TB)    f32   (lane-dense)

    # Layer 1: contract w1's feature axis with x's feature axis -> feature-major
    # (256, TB) activations.  f32 operands (K = D is a single MXU K-tile; keeps the
    # raw observations un-quantized).
    h1 = lax.dot_general(
        w1_ref[...], x_ref[...],
        dimension_numbers=(((1,), (1,)), ((), ())),
        preferred_element_type=jnp.float32,
    ) + b1_ref[...]
    h1 = jnp.maximum(h1, 0.0)

    # Layer 2: (256, 256) @ (256, TB) with bf16 MXU inputs, f32 accumulation.
    h2 = jnp.dot(w2_ref[...], h1.astype(jnp.bfloat16),
                 preferred_element_type=jnp.float32) + b2_ref[...]
    h2 = jnp.maximum(h2, 0.0)

    # Layer 3 (256 -> 1): VPU multiply + cross-sublane reduce -> lane-dense (1, TB).
    v = jnp.sum(h2 * w3_ref[...], axis=0, keepdims=True) + b3_ref[0, 0]
    o_ref[...] = v.astype(o_ref.dtype)


def _pick_batch_tile(B, D):
    """Batch tile (multiple of 128 lanes), tile count, padded batch."""
    cap = 2048  # big enough to amortize the ~600-cycle per-step pipeline overhead
    # Derate from a per-lane VMEM estimate: double-buffered f32 x tile + f32/bf16
    # intermediates; stays well inside the 32 MiB scoped limit on every generation.
    budget = 24 * 1024 * 1024
    bytes_per_lane = 2 * 4 * D + 3 * 4 * HIDDEN
    cap = max(_LANE, min(cap, (budget // bytes_per_lane) // _LANE * _LANE))

    b_pad = _round_up(max(B, 1), _LANE)
    # >= 2 tiles whenever there is enough work so both v7x TensorCores get a tile;
    # essentially free on single-TC v5e/v6e.
    min_tiles = 2 if b_pad >= 2 * _LANE else 1
    num_tiles = max(min_tiles, _cdiv(b_pad, cap))
    tb = _round_up(_cdiv(b_pad, num_tiles), _LANE)
    num_tiles = _cdiv(b_pad, tb)
    return tb, num_tiles, num_tiles * tb


def valuenet_forward(x, params):
    """x: (B, state_dim) f32 -> squeezed value, like torch.squeeze(model(x))."""
    w1, b1, w2, b2, w3, b3 = params
    B, D = x.shape
    if B == 0:
        return jnp.zeros((0,), jnp.float32)

    TB, num_tiles, B_pad = _pick_batch_tile(B, D)

    # No transpose.  Pad only the ragged batch remainder (no-op when B is a multiple
    # of the tile; tiny otherwise).  Padded lanes never contaminate valid outputs —
    # columns are independent — and are sliced off below.
    if B_pad != B:
        x = jnp.pad(x, ((0, B_pad - B), (0, 0)))

    out = pl.pallas_call(
        _valuenet_kernel,
        out_shape=jax.ShapeDtypeStruct((1, B_pad), jnp.float32),
        grid=(num_tiles,),
        in_specs=[
            pl.BlockSpec((TB, D), lambda i: (i, 0)),            # x tile, pipelined
            pl.BlockSpec((HIDDEN, D), lambda i: (0, 0)),        # w1, VMEM-resident
            pl.BlockSpec((HIDDEN, 1), lambda i: (0, 0)),        # b1, resident
            pl.BlockSpec((HIDDEN, HIDDEN), lambda i: (0, 0)),   # w2, resident
            pl.BlockSpec((HIDDEN, 1), lambda i: (0, 0)),        # b2, resident
            pl.BlockSpec((HIDDEN, 1), lambda i: (0, 0)),        # w3 column, resident
            pl.BlockSpec(memory_space=pltpu.MemorySpace.SMEM),  # b3 scalar
        ],
        out_specs=pl.BlockSpec((1, TB), lambda i: (0, i)),      # lane-dense output tile
        compiler_params=pltpu.CompilerParams(
            dimension_semantics=("parallel",),
            vmem_limit_bytes=32 * 1024 * 1024,
        ),
    )(x, w1, b1, w2, b2, w3, b3)

    # (1, B_pad) -> (B,), then mimic torch.squeeze (drops to scalar when B == 1).
    return jnp.squeeze(out[0, :B])


def init_valuenet_params(key, state_dim):
    """PyTorch-like init (uniform +/- 1/sqrt(fan_in)); weights stored (out, in)."""
    def linear(k, fan_in, fan_out):
        k_w, k_b = jax.random.split(k)
        bound = 1.0 / jnp.sqrt(fan_in)
        w = jax.random.uniform(k_w, (fan_out, fan_in), jnp.float32, -bound, bound)
        b = jax.random.uniform(k_b, (fan_out, 1), jnp.float32, -bound, bound)
        return w, b

    k1, k2, k3 = jax.random.split(key, 3)
    w1, b1 = linear(k1, state_dim, HIDDEN)   # (256, D), (256, 1)
    w2, b2 = linear(k2, HIDDEN, HIDDEN)      # (256, 256), (256, 1)
    w3, b3 = linear(k3, HIDDEN, 1)           # (1, 256), (1, 1)
    # Kernel layout: w1 stays f32 (un-quantized input path), w2 in bf16 for the MXU,
    # w3 reshaped to an f32 (256, 1) column for the VPU reduce.
    return (w1, b1,
            w2.astype(jnp.bfloat16), b2,
            w3.reshape(HIDDEN, 1), b3)


def valuenet_reference(x, params):
    """Pure-JAX reference using the same stored weights, all-f32 math."""
    w1, b1, w2, b2, w3, b3 = params
    w2 = w2.astype(jnp.float32)
    h1 = jnp.maximum(x @ w1.T + b1[:, 0], 0.0)
    h2 = jnp.maximum(h1 @ w2.T + b2[:, 0], 0.0)
    return jnp.squeeze(h2 @ w3[:, 0] + b3[0, 0])


if __name__ == "__main__":
    key = jax.random.PRNGKey(0)
    k_x, k_x2, k_p = jax.random.split(key, 3)

    batch, state_dim = 8, 32
    params = init_valuenet_params(k_p, state_dim)

    # Small batch: single tile, ragged-pad path (matches the RL common case).
    x = jax.random.normal(k_x, (batch, state_dim), jnp.float32)
    out = jax.block_until_ready(valuenet_forward(x, params))
    ref = valuenet_reference(x, params)
    assert out.shape == (batch,), out.shape
    assert jnp.allclose(out, ref, atol=1e-2, rtol=1e-2), (out, ref)

    # Larger batch: exercises >= 2 batch tiles (v7x dual-TC split) and partial pad.
    x2 = jax.random.normal(k_x2, (300, state_dim), jnp.float32)
    out2 = jax.block_until_ready(valuenet_forward(x2, params))
    ref2 = valuenet_reference(x2, params)
    assert out2.shape == (300,), out2.shape
    assert jnp.allclose(out2, ref2, atol=1e-2, rtol=1e-2), (out2, ref2)

    print("KERNEL_OK")
</pallas_src>

<mosaic_0001>
module attributes {stable_mosaic.version = 11 : i64} {
  func.func @_valuenet_kernel(%arg0: i32, %arg1: memref<128x32xf32, #tpu.memory_space<vmem>>, %arg2: memref<256x32xf32, #tpu.memory_space<vmem>>, %arg3: memref<256x1xf32, #tpu.memory_space<vmem>>, %arg4: memref<256x256xbf16, #tpu.memory_space<vmem>>, %arg5: memref<256x1xf32, #tpu.memory_space<vmem>>, %arg6: memref<256x1xf32, #tpu.memory_space<vmem>>, %arg7: memref<1x1xf32, #tpu.memory_space<smem>>, %arg8: memref<1x128xf32, #tpu.memory_space<vmem>>) attributes {dimension_semantics = [#tpu.dimension_semantics<parallel>], iteration_bounds = array<i64: 1>, scalar_prefetch = 0 : i64, scratch_operands = 0 : i64, tpu.core_type = #tpu.core_type<tc>, window_params = [{transform_indices = @transform_0, window_bounds = array<i64: 128, 32>}, {pipeline_mode = #tpu.pipeline_mode<synchronous>, transform_indices = @transform_1, window_bounds = array<i64: 256, 32>}, {pipeline_mode = #tpu.pipeline_mode<synchronous>, transform_indices = @transform_2, window_bounds = array<i64: 256, 1>}, {pipeline_mode = #tpu.pipeline_mode<synchronous>, transform_indices = @transform_3, window_bounds = array<i64: 256, 256>}, {pipeline_mode = #tpu.pipeline_mode<synchronous>, transform_indices = @transform_4, window_bounds = array<i64: 256, 1>}, {pipeline_mode = #tpu.pipeline_mode<synchronous>, transform_indices = @transform_5, window_bounds = array<i64: 256, 1>}, {transform_indices = @transform_6, window_bounds = array<i64: 1, 1>}, {transform_indices = @transform_7, window_bounds = array<i64: 1, 128>}]} {
    %c0 = arith.constant 0 : index
    %c0_0 = arith.constant 0 : index
    %0 = vector.load %arg2[%c0, %c0_0] : memref<256x32xf32, #tpu.memory_space<vmem>>, vector<256x32xf32>
    %c0_1 = arith.constant 0 : index
    %c0_2 = arith.constant 0 : index
    %1 = vector.load %arg1[%c0_1, %c0_2] : memref<128x32xf32, #tpu.memory_space<vmem>>, vector<128x32xf32>
    %cst = arith.constant dense<0.000000e+00> : vector<256x128xf32>
    %2 = tpu.matmul %0, %1, %cst {dimension_numbers = #tpu.dot_dimension_numbers<[1], [1], [0], [0], [0, 0, 1, 0], [], []>} : vector<256x32xf32>, vector<128x32xf32>, vector<256x128xf32> -> vector<256x128xf32>
    %c0_3 = arith.constant 0 : index
    %c0_4 = arith.constant 0 : index
    %3 = vector.load %arg3[%c0_3, %c0_4] : memref<256x1xf32, #tpu.memory_space<vmem>>, vector<256x1xf32>
    %4 = vector.broadcast %3 : vector<256x1xf32> to vector<256x128xf32>
    %5 = arith.addf %2, %4 : vector<256x128xf32>
    %cst_5 = arith.constant 0.000000e+00 : f32
    %6 = vector.broadcast %cst_5 : f32 to vector<256x128xf32>
    %7 = arith.maximumf %5, %6 : vector<256x128xf32>
    %c0_6 = arith.constant 0 : index
    %c0_7 = arith.constant 0 : index
    %8 = vector.load %arg4[%c0_6, %c0_7] : memref<256x256xbf16, #tpu.memory_space<vmem>>, vector<256x256xbf16>
    %9 = arith.truncf %7 : vector<256x128xf32> to vector<256x128xbf16>
    %cst_8 = arith.constant dense<0.000000e+00> : vector<256x128xf32>
    %10 = tpu.matmul %8, %9, %cst_8 {dimension_numbers = #tpu.dot_dimension_numbers<[1], [0], [0], [1], [0, 0, 1, 1], [], []>} : vector<256x256xbf16>, vector<256x128xbf16>, vector<256x128xf32> -> vector<256x128xf32>
    %c0_9 = arith.constant 0 : index
    %c0_10 = arith.constant 0 : index
    %11 = vector.load %arg5[%c0_9, %c0_10] : memref<256x1xf32, #tpu.memory_space<vmem>>, vector<256x1xf32>
    %12 = vector.broadcast %11 : vector<256x1xf32> to vector<256x128xf32>
    %13 = arith.addf %10, %12 : vector<256x128xf32>
    %cst_11 = arith.constant 0.000000e+00 : f32
    %14 = vector.broadcast %cst_11 : f32 to vector<256x128xf32>
    %15 = arith.maximumf %13, %14 : vector<256x128xf32>
    %c0_12 = arith.constant 0 : index
    %c0_13 = arith.constant 0 : index
    %16 = vector.load %arg6[%c0_12, %c0_13] : memref<256x1xf32, #tpu.memory_space<vmem>>, vector<256x1xf32>
    %17 = vector.broadcast %16 : vector<256x1xf32> to vector<256x128xf32>
    %18 = arith.mulf %15, %17 : vector<256x128xf32>
    %cst_14 = arith.constant dense<0.000000e+00> : vector<128xf32>
    %19 = vector.multi_reduction <add>, %18, %cst_14 [0] : vector<256x128xf32> to vector<128xf32>
    %20 = vector.shape_cast %19 : vector<128xf32> to vector<1x128xf32>
    %c0_15 = arith.constant 0 : index
    %c0_16 = arith.constant 0 : index
    %21 = memref.load %arg7[%c0_15, %c0_16] : memref<1x1xf32, #tpu.memory_space<smem>>
    %22 = vector.broadcast %21 : f32 to vector<1x128xf32>
    %23 = arith.addf %20, %22 : vector<1x128xf32>
    %c0_17 = arith.constant 0 : index
    %c0_18 = arith.constant 0 : index
    %24 = vector.load %arg8[%c0_17, %c0_18] : memref<1x128xf32, #tpu.memory_space<vmem>>, vector<1x128xf32>
    tpu.vector_store %arg8[%c0_17, %c0_18], %23 {strides = array<i32>} : memref<1x128xf32, #tpu.memory_space<vmem>>, vector<1x128xf32>,
    return
  }
  func.func @transform_0(%arg0: i32) -> (i32, i32) {
    %c0_i32 = arith.constant 0 : i32
    %c0_i32_0 = arith.constant 0 : i32
    return %arg0, %c0_i32 : i32, i32
  }
  func.func @transform_1(%arg0: i32) -> (i32, i32) {
    %c0_i32 = arith.constant 0 : i32
    %c0_i32_0 = arith.constant 0 : i32
    %c0_i32_1 = arith.constant 0 : i32
    return %c0_i32, %c0_i32_0 : i32, i32
  }
  func.func @transform_2(%arg0: i32) -> (i32, i32) {
    %c0_i32 = arith.constant 0 : i32
    %c0_i32_0 = arith.constant 0 : i32
    %c0_i32_1 = arith.constant 0 : i32
    return %c0_i32, %c0_i32_0 : i32, i32
  }
  func.func @transform_3(%arg0: i32) -> (i32, i32) {
    %c0_i32 = arith.constant 0 : i32
    %c0_i32_0 = arith.constant 0 : i32
    %c0_i32_1 = arith.constant 0 : i32
    return %c0_i32, %c0_i32_0 : i32, i32
  }
  func.func @transform_4(%arg0: i32) -> (i32, i32) {
    %c0_i32 = arith.constant 0 : i32
    %c0_i32_0 = arith.constant 0 : i32
    %c0_i32_1 = arith.constant 0 : i32
    return %c0_i32, %c0_i32_0 : i32, i32
  }
  func.func @transform_5(%arg0: i32) -> (i32, i32) {
    %c0_i32 = arith.constant 0 : i32
    %c0_i32_0 = arith.constant 0 : i32
    %c0_i32_1 = arith.constant 0 : i32
    return %c0_i32, %c0_i32_0 : i32, i32
  }
  func.func @transform_6(%arg0: i32) -> (i32, i32) {
    %c0_i32 = arith.constant 0 : i32
    %c0_i32_0 = arith.constant 0 : i32
    %c0_i32_1 = arith.constant 0 : i32
    return %c0_i32, %c0_i32_0 : i32, i32
  }
  func.func @transform_7(%arg0: i32) -> (i32, i32) {
    %c0_i32 = arith.constant 0 : i32
    %c0_i32_0 = arith.constant 0 : i32
    return %c0_i32, %arg0 : i32, i32
  }
}

</mosaic_0001>

<bundles_post_ra>
// kernel: tpu_custom_call.1
= control target key start
LH: loop header
LB: loop body
LE: loop exit
PB: predicated region body
PF: predicated region fallthrough
CT: control target
= control target key end

     0   :  { %vm269_vm0 = vcmask 261120   ;;  %v2003_v3 = vmov 0   ;;  %s2807_s0 = inlined_call_operand.vmem [shape: f32[128,32], index: 0, kind: input, shape index: {}]   ;;  %s2808_s1 = inlined_call_operand.vmem [shape: f32[256,32], index: 1, kind: input, shape index: {}]   ;;  %s2809_s2 = inlined_call_operand.vmem [shape: f32[256,1], index: 2, kind: input, shape index: {}]   ;;  %s2810_s3 = inlined_call_operand.vmem [shape: bf16[256,256], index: 3, kind: input, shape index: {}]   ;;  %s2811_s4 = inlined_call_operand.vmem [shape: f32[256,1], index: 4, kind: input, shape index: {}]   ;;  %s2812_s5 = inlined_call_operand.vmem [shape: f32[256,1], index: 5, kind: input, shape index: {}]   ;;  %s2813_s6 = inlined_call_operand.<no memory space> [shape: f32[1,1], index: 6, kind: input, shape index: {}]   ;;  %s2814_s7 = inlined_call_operand.hbm [shape: f32[1,128], index: 7, kind: output, shape index: {}]  }
   0x1   :  { %v93_v0 = vld [vmem:[%s2809_s2 + $0x80] sm:$0xff]  ;;  %1930 = vset.pattern.permute.xlu1 %v2003_v3  ;;  %1929 = vset.pattern.permute.xlu0 %v2003_v3  ;;  %v62_v4 = vld [vmem:[%s2807_s0 + $0x8] sm:$0xff]  ;;  %vm2059_vm1 = vmpackc.low %vm269_vm0, %vm269_vm0 }
   0x2   :  { %v77_v1 = vld [vmem:[%s2809_s2] sm:$0xff]  ;;  %191 = vperm.xlu0 %1929, %v93_v0   ;;  %v94_v7 = vld [vmem:[%s2809_s2 + $0x88] sm:$0xff]  ;;  %v63_v9 = vld [vmem:[%s2807_s0 + $0x10] sm:$0xff] }
   0x3   :  { %v61_v2 = vld [vmem:[%s2807_s0] sm:$0xff]  ;;  %111 = vperm.xlu1 %1930, %v77_v1   ;;  %v78_v8 = vld [vmem:[%s2809_s2 + $0x8] sm:$0xff]  ;;  %v64_v10 = vld [vmem:[%s2807_s0 + $0x18] sm:$0xff] }
   0x4   :  { %v1863_v6 = vpack.c.bf16 %v62_v4, %v61_v2  ;;  %v1869_v11 = vpack.c.bf16 %v64_v10, %v63_v9  ;;  %v95_v12 = vld [vmem:[%s2809_s2 + $0x90] sm:$0xff]  ;;  %v96_v13 = vld [vmem:[%s2809_s2 + $0x98] sm:$0xff]  ;;  %v65_v14 = vld [vmem:[%s2807_s0 + $0x20] sm:$0xff] }
   0x5   :  { %v66_v15 = vld [vmem:[%s2807_s0 + $0x28] sm:$0xff]  ;;  %v79_v16 = vld [vmem:[%s2809_s2 + $0x10] sm:$0xff]  ;;  %v80_v17 = vld [vmem:[%s2809_s2 + $0x18] sm:$0xff] }
   0x6   :  { %1865 = vmatprep.subr.msk.bf16.mxu0 %vm2059_vm1, %v1863_v6  ;;  %196 = vperm.xlu0 %1929, %v94_v7   ;;  %v1875_v18 = vpack.c.bf16 %v66_v15, %v65_v14  ;;  %v97_v19 = vld [vmem:[%s2809_s2 + $0xa0] sm:$0xff]  ;;  %v98_v20 = vld [vmem:[%s2809_s2 + $0xa8] sm:$0xff]  ;;  %v67_v21 = vld [vmem:[%s2807_s0 + $0x30] sm:$0xff] }
   0x7   :  { %1868 = vmatpush3.bf16.xpose.msk.msra.mxu0 %vm2059_vm1, %v1863_v6  ;;  %116 = vperm.xlu1 %1930, %v78_v8   ;;  %v68_v22 = vld [vmem:[%s2807_s0 + $0x38] sm:$0xff]  ;;  %v29_v23 = vld [vmem:[%s2808_s1] sm:$0xff]  ;;  %v82_v25 = vld [vmem:[%s2809_s2 + $0x28] sm:$0xff] }
   0x8   :  { %1871 = vmatprep.subr.msk.bf16.mxu0 %vm2059_vm1, %v1869_v11  ;;  %v81_v24 = vld [vmem:[%s2809_s2 + $0x20] sm:$0xff]  ;;  %v1881_v26 = vpack.c.bf16 %v68_v22, %v67_v21  ;;  %1815 = vmatprep.mubr.msk.f32.mxu0 %vm269_vm0, %v29_v23  ;;  %v99_v27 = vld [vmem:[%s2809_s2 + $0xb0] sm:$0xff]  ;;  %v100_v28 = vld [vmem:[%s2809_s2 + $0xb8] sm:$0xff] }
   0x9   :  { %v69_v29 = vld [vmem:[%s2807_s0 + $0x40] sm:$0xff]  ;;  %v70_v30 = vld [vmem:[%s2807_s0 + $0x48] sm:$0xff]  ;;  %v83_v31 = vld [vmem:[%s2809_s2 + $0x30] sm:$0xff] }
   0xa   :  { %201 = vperm.xlu0 %1929, %v95_v12   ;;  %v84_v32 = vld [vmem:[%s2809_s2 + $0x38] sm:$0xff]  ;;  %v1887_v33 = vpack.c.bf16 %v70_v30, %v69_v29  ;;  %v101_v34 = vld [vmem:[%s2809_s2 + $0xc0] sm:$0xff]  ;;  %v102_v35 = vld [vmem:[%s2809_s2 + $0xc8] sm:$0xff] }
   0xb   :  { %206 = vperm.xlu1 %1930, %v96_v13   ;;  %v71_v36 = vld [vmem:[%s2807_s0 + $0x50] sm:$0xff]  ;;  %v72_v37 = vld [vmem:[%s2807_s0 + $0x58] sm:$0xff]  ;;  %v85_v38 = vld [vmem:[%s2809_s2 + $0x40] sm:$0xff] }
   0xc   :  { %v86_v39 = vld [vmem:[%s2809_s2 + $0x48] sm:$0xff]  ;;  %v1893_v40 = vpack.c.bf16 %v72_v37, %v71_v36  ;;  %v103_v41 = vld [vmem:[%s2809_s2 + $0xd0] sm:$0xff]  ;;  %v104_v42 = vld [vmem:[%s2809_s2 + $0xd8] sm:$0xff] }
   0xd   :  { %v73_v43 = vld [vmem:[%s2807_s0 + $0x60] sm:$0xff]  ;;  %v74_v44 = vld [vmem:[%s2807_s0 + $0x68] sm:$0xff]  ;;  %v87_v45 = vld [vmem:[%s2809_s2 + $0x50] sm:$0xff] }
   0xe   :  { %121 = vperm.xlu0 %1929, %v79_v16   ;;  %v88_v46 = vld [vmem:[%s2809_s2 + $0x58] sm:$0xff]  ;;  %v1899_v47 = vpack.c.bf16 %v74_v44, %v73_v43  ;;  %v105_v48 = vld [vmem:[%s2809_s2 + $0xe0] sm:$0xff]  ;;  %v106_v49 = vld [vmem:[%s2809_s2 + $0xe8] sm:$0xff] }
   0xf   :  { %1874 = vmatpush3.bf16.xpose.msk.msra.mxu0 %vm2059_vm1, %v1869_v11  ;;  %126 = vperm.xlu1 %1930, %v80_v17   ;;  %v75_v50 = vld [vmem:[%s2807_s0 + $0x70] sm:$0xff]  ;;  %v76_v51 = vld [vmem:[%s2807_s0 + $0x78] sm:$0xff]  ;;  %v89_v52 = vld [vmem:[%s2809_s2 + $0x60] sm:$0xff] }
  0x10   :  { %1877 = vmatprep.subr.msk.bf16.mxu0 %vm2059_vm1, %v1875_v18  ;;  %v90_v53 = vld [vmem:[%s2809_s2 + $0x68] sm:$0xff]  ;;  %v1905_v54 = vpack.c.bf16 %v76_v51, %v75_v50  ;;  %v107_v55 = vld [vmem:[%s2809_s2 + $0xf0] sm:$0xff]  ;;  %v108_v56 = vld [vmem:[%s2809_s2 + $0xf8] sm:$0xff] }
  0x12   :  { %211 = vperm.xlu0 %1929, %v97_v19  }
  0x13   :  { %216 = vperm.xlu1 %1930, %v98_v20  }
  0x16   :  { %131 = vperm.xlu0 %1929, %v81_v24  }
  0x17   :  { %1880 = vmatpush3.bf16.xpose.msk.msra.mxu0 %vm2059_vm1, %v1875_v18  ;;  %136 = vperm.xlu1 %1930, %v82_v25  }
  0x18   :  { %1883 = vmatprep.subr.msk.bf16.mxu0 %vm2059_vm1, %v1881_v26 }
  0x1a   :  { %221 = vperm.xlu0 %1929, %v99_v27  }
  0x1b   :  { %226 = vperm.xlu1 %1930, %v100_v28  }
  0x1e   :  { %141 = vperm.xlu0 %1929, %v83_v31  }
  0x1f   :  { %1886 = vmatpush3.bf16.xpose.msk.msra.mxu0 %vm2059_vm1, %v1881_v26  ;;  %146 = vperm.xlu1 %1930, %v84_v32  }
  0x20   :  { %1889 = vmatprep.subr.msk.bf16.mxu0 %vm2059_vm1, %v1887_v33 }
  0x22   :  { %231 = vperm.xlu0 %1929, %v101_v34  }
  0x23   :  { %236 = vperm.xlu1 %1930, %v102_v35  }
  0x26   :  { %151 = vperm.xlu0 %1929, %v85_v38  }
  0x27   :  { %1892 = vmatpush3.bf16.xpose.msk.msra.mxu0 %vm2059_vm1, %v1887_v33  ;;  %156 = vperm.xlu1 %1930, %v86_v39  }
  0x28   :  { %1895 = vmatprep.subr.msk.bf16.mxu0 %vm2059_vm1, %v1893_v40 }
  0x2a   :  { %241 = vperm.xlu0 %1929, %v103_v41  }
  0x2b   :  { %246 = vperm.xlu1 %1930, %v104_v42  }
  0x2e   :  { %161 = vperm.xlu0 %1929, %v87_v45  }
  0x2f   :  { %1898 = vmatpush3.bf16.xpose.msk.msra.mxu0 %vm2059_vm1, %v1893_v40  ;;  %166 = vperm.xlu1 %1930, %v88_v46  }
  0x30   :  { %1901 = vmatprep.subr.msk.bf16.mxu0 %vm2059_vm1, %v1899_v47 }
  0x32   :  { %251 = vperm.xlu0 %1929, %v105_v48  }
  0x33   :  { %256 = vperm.xlu1 %1930, %v106_v49  }
  0x36   :  { %171 = vperm.xlu0 %1929, %v89_v52  }
  0x37   :  { %1904 = vmatpush3.bf16.xpose.msk.msra.mxu0 %vm2059_vm1, %v1899_v47  ;;  %176 = vperm.xlu1 %1930, %v90_v53  }
  0x38   :  { %1907 = vmatprep.subr.msk.bf16.mxu0 %vm2059_vm1, %v1905_v54 }
  0x3a   :  { %261 = vperm.xlu0 %1929, %v107_v55  }
  0x3b   :  { %266 = vperm.xlu1 %1930, %v108_v56  }
  0x3c   :  { %13 = vsyncpa [#allocation4], 0  ;;  %v91_v57 = vld [vmem:[%s2809_s2 + $0x70] sm:$0xff]  ;;  %v92_v58 = vld [vmem:[%s2809_s2 + $0x78] sm:$0xff]  ;;  %s2004_s0 = smov [#allocation3]  }
  0x3d   :  { %v719_v59 = vld [vmem:[%s2811_s4] sm:$0xff]  ;;  %v720_v60 = vld [vmem:[%s2811_s4 + $0x8] sm:$0xff]  ;;  %v31_v62 = vld [vmem:[%s2808_s1 + $0x10] sm:$0xff]  ;;  %s1535_s24 = sshll.u32 %s2004_s0, 4  ;;  %s1536_s24 = int_to_ptr.vmem [resolvable:$true] %s1535_s24 }
  0x3e   :  { %181 = vperm.xlu0 %1929, %v91_v57   ;;  %v30_v61 = vld [vmem:[%s2808_s1 + $0x8] sm:$0xff]  ;;  %v721_v63 = vld [vmem:[%s2811_s4 + $0x10] sm:$0xff]  ;;  %v722_v0 = vld [vmem:[%s2811_s4 + $0x18] sm:$0xff]  ;;  %s1979_s25 = scalar_lea.vmem %s1536_s24, 16  ;;  %s1983_s26 = scalar_lea.vmem %s1536_s24, 32 }
  0x3f   :  { %1910 = vmatpush3.bf16.xpose.msk.msra.mxu0 %vm2059_vm1, %v1905_v54  ;;  %186 = vperm.xlu1 %1930, %v92_v58   ;;  %v32_v1 = vld [vmem:[%s2808_s1 + $0x18] sm:$0xff]  ;;  %v33_v2 = vld [vmem:[%s2808_s1 + $0x20] sm:$0xff]  ;;  %v724_v4 = vld [vmem:[%s2811_s4 + $0x28] sm:$0xff]  ;;  %p1980_p0 = scmp.ne.s32.totalorder %s1536_s24, %s1979_s25  ;;  %p1984_p1 = scmp.lt.s32.totalorder %s1536_s24, %s1536_s24 }
  0x40   :  { %v723_v3 = vld [vmem:[%s2811_s4 + $0x20] sm:$0xff]  ;;  %v34_v5 = vld [vmem:[%s2808_s1 + $0x28] sm:$0xff]  ;;  %v35_v6 = vld [vmem:[%s2808_s1 + $0x30] sm:$0xff]  ;;  %p1985_p2 = scmp.lt.s32.totalorder %s1983_s26, %s1979_s25 }
  0x41   :  { %v725_v7 = vld [vmem:[%s2811_s4 + $0x30] sm:$0xff]  ;;  %v726_v8 = vld [vmem:[%s2811_s4 + $0x38] sm:$0xff]  ;;  %v37_v10 = vld [vmem:[%s2808_s1 + $0x40] sm:$0xff] }
  0x42   :  { %753 = vperm.xlu0 %1929, %v719_v59   ;;  %v36_v9 = vld [vmem:[%s2808_s1 + $0x38] sm:$0xff]  ;;  %v727_v11 = vld [vmem:[%s2811_s4 + $0x40] sm:$0xff]  ;;  %v728_v12 = vld [vmem:[%s2811_s4 + $0x48] sm:$0xff]  ;;  %p1986_p3 = por %p1985_p2, %p1984_p1 }
  0x43   :  { %758 = vperm.xlu1 %1930, %v720_v60   ;;  %v38_v13 = vld [vmem:[%s2808_s1 + $0x48] sm:$0xff]  ;;  %v39_v14 = vld [vmem:[%s2808_s1 + $0x50] sm:$0xff]  ;;  %v730_v16 = vld [vmem:[%s2811_s4 + $0x58] sm:$0xff] }
  0x44   :  { %v729_v15 = vld [vmem:[%s2811_s4 + $0x50] sm:$0xff]  ;;  %v40_v17 = vld [vmem:[%s2808_s1 + $0x58] sm:$0xff]  ;;  %v41_v18 = vld [vmem:[%s2808_s1 + $0x60] sm:$0xff]  ;;  %p1987_p4 = pnand %p1986_p3, %p1980_p0 }
  0x45   :  { %v731_v19 = vld [vmem:[%s2811_s4 + $0x60] sm:$0xff]  ;;  %v732_v20 = vld [vmem:[%s2811_s4 + $0x68] sm:$0xff]  ;;  %v43_v22 = vld [vmem:[%s2808_s1 + $0x70] sm:$0xff] }
  0x46   :  { %1816 = vmatmul.mubr.msk.f32.vlgmr.msra.gmra.mrb[0].mxu0 %vm269_vm0, %v30_v61  ;;  %763 = vperm.xlu0 %1929, %v721_v63   ;;  %v42_v21 = vld [vmem:[%s2808_s1 + $0x68] sm:$0xff]  ;;  %v733_v23 = vld [vmem:[%s2811_s4 + $0x70] sm:$0xff]  ;;  %v734_v24 = vld [vmem:[%s2811_s4 + $0x78] sm:$0xff] }
  0x47   :  { %1818 = vmatprep.mubr.msk.f32.mxu0 %vm269_vm0, %v31_v62  ;;  %768 = vperm.xlu1 %1930, %v722_v0   ;;  %v44_v25 = vld [vmem:[%s2808_s1 + $0x78] sm:$0xff]  ;;  %v45_v26 = vld [vmem:[%s2808_s1 + $0x80] sm:$0xff]  ;;  %v736_v28 = vld [vmem:[%s2811_s4 + $0x88] sm:$0xff] }
  0x48   :  { %v735_v27 = vld [vmem:[%s2811_s4 + $0x80] sm:$0xff]  ;;  %v46_v29 = vld [vmem:[%s2808_s1 + $0x88] sm:$0xff]  ;;  %v47_v30 = vld [vmem:[%s2808_s1 + $0x90] sm:$0xff] }
  0x49   :  { %v737_v31 = vld [vmem:[%s2811_s4 + $0x90] sm:$0xff]  ;;  %v738_v32 = vld [vmem:[%s2811_s4 + $0x98] sm:$0xff]  ;;  %v49_v34 = vld [vmem:[%s2808_s1 + $0xa0] sm:$0xff] }
  0x4a   :  { %1819 = vmatmul.mubr.msk.f32.gmra.mrb[2].mxu0 %vm269_vm0, %v32_v1  ;;  %773 = vperm.xlu0 %1929, %v723_v3   ;;  %v48_v33 = vld [vmem:[%s2808_s1 + $0x98] sm:$0xff]  ;;  %v739_v35 = vld [vmem:[%s2811_s4 + $0xa0] sm:$0xff]  ;;  %v740_v36 = vld [vmem:[%s2811_s4 + $0xa8] sm:$0xff] }
  0x4b   :  { %1821 = vmatprep.mubr.msk.f32.mxu0 %vm269_vm0, %v33_v2  ;;  %778 = vperm.xlu1 %1930, %v724_v4   ;;  %v50_v37 = vld [vmem:[%s2808_s1 + $0xa8] sm:$0xff]  ;;  %v51_v38 = vld [vmem:[%s2808_s1 + $0xb0] sm:$0xff]  ;;  %v742_v40 = vld [vmem:[%s2811_s4 + $0xb8] sm:$0xff] }
  0x4c   :  { %v741_v39 = vld [vmem:[%s2811_s4 + $0xb0] sm:$0xff]  ;;  %v52_v41 = vld [vmem:[%s2808_s1 + $0xb8] sm:$0xff]  ;;  %v53_v42 = vld [vmem:[%s2808_s1 + $0xc0] sm:$0xff] }
  0x4d   :  { %v743_v43 = vld [vmem:[%s2811_s4 + $0xc0] sm:$0xff]  ;;  %v744_v44 = vld [vmem:[%s2811_s4 + $0xc8] sm:$0xff]  ;;  %v55_v46 = vld [vmem:[%s2808_s1 + $0xd0] sm:$0xff] }
  0x4e   :  { %1822 = vmatmul.mubr.msk.f32.gmra.mrb[4].mxu0 %vm269_vm0, %v34_v5  ;;  %783 = vperm.xlu0 %1929, %v725_v7   ;;  %v54_v45 = vld [vmem:[%s2808_s1 + $0xc8] sm:$0xff]  ;;  %v745_v47 = vld [vmem:[%s2811_s4 + $0xd0] sm:$0xff]  ;;  %v746_v48 = vld [vmem:[%s2811_s4 + $0xd8] sm:$0xff] }
  0x4f   :  { %1824 = vmatprep.mubr.msk.f32.mxu0 %vm269_vm0, %v35_v6  ;;  %788 = vperm.xlu1 %1930, %v726_v8   ;;  %v56_v49 = vld [vmem:[%s2808_s1 + $0xd8] sm:$0xff]  ;;  %v57_v50 = vld [vmem:[%s2808_s1 + $0xe0] sm:$0xff]  ;;  %v1265_v52 = vld [vmem:[%s2812_s5 + $0x8] sm:$0xff] }
  0x50   :  { %v1264_v51 = vld [vmem:[%s2812_s5] sm:$0xff]  ;;  %v58_v53 = vld [vmem:[%s2808_s1 + $0xe8] sm:$0xff]  ;;  %v59_v54 = vld [vmem:[%s2808_s1 + $0xf0] sm:$0xff] }
  0x51   :  { %v1266_v55 = vld [vmem:[%s2812_s5 + $0x10] sm:$0xff]  ;;  %v1267_v56 = vld [vmem:[%s2812_s5 + $0x18] sm:$0xff]  ;;  %v1268_v58 = vld [vmem:[%s2812_s5 + $0x20] sm:$0xff] }
  0x52   :  { %1825 = vmatmul.mubr.msk.f32.gmra.mrb[6].mxu0 %vm269_vm0, %v36_v9  ;;  %793 = vperm.xlu0 %1929, %v727_v11   ;;  %v60_v57 = vld [vmem:[%s2808_s1 + $0xf8] sm:$0xff]  ;;  %v1269_v59 = vld [vmem:[%s2812_s5 + $0x28] sm:$0xff]  ;;  %v1270_v60 = vld [vmem:[%s2812_s5 + $0x30] sm:$0xff] }
  0x53   :  { %1827 = vmatprep.mubr.msk.f32.mxu0 %vm269_vm0, %v37_v10  ;;  %798 = vperm.xlu1 %1930, %v728_v12   ;;  %v1271_v61 = vld [vmem:[%s2812_s5 + $0x38] sm:$0xff]  ;;  %v1272_v62 = vld [vmem:[%s2812_s5 + $0x40] sm:$0xff]  ;;  %v1273_v63 = vld [vmem:[%s2812_s5 + $0x48] sm:$0xff] }
  0x54   :  { %v1274_v0 = vld [vmem:[%s2812_s5 + $0x50] sm:$0xff]  ;;  %v1275_v1 = vld [vmem:[%s2812_s5 + $0x58] sm:$0xff]  ;;  %v1276_v2 = vld [vmem:[%s2812_s5 + $0x60] sm:$0xff] }
  0x55   :  { %v1277_v3 = vld [vmem:[%s2812_s5 + $0x68] sm:$0xff]  ;;  %v1278_v4 = vld [vmem:[%s2812_s5 + $0x70] sm:$0xff]  ;;  %v1279_v5 = vld [vmem:[%s2812_s5 + $0x78] sm:$0xff] }
  0x56   :  { %1828 = vmatmul.mubr.msk.f32.gmra.mrb[8].mxu0 %vm269_vm0, %v38_v13  ;;  %803 = vperm.xlu0 %1929, %v729_v15   ;;  %v1280_v6 = vld [vmem:[%s2812_s5 + $0x80] sm:$0xff]  ;;  %v1281_v7 = vld [vmem:[%s2812_s5 + $0x88] sm:$0xff]  ;;  %v1282_v8 = vld [vmem:[%s2812_s5 + $0x90] sm:$0xff] }
  0x57   :  { %1830 = vmatprep.mubr.msk.f32.mxu0 %vm269_vm0, %v39_v14  ;;  %808 = vperm.xlu1 %1930, %v730_v16   ;;  %v1283_v9 = vld [vmem:[%s2812_s5 + $0x98] sm:$0xff]  ;;  %v1284_v10 = vld [vmem:[%s2812_s5 + $0xa0] sm:$0xff]  ;;  %v1285_v11 = vld [vmem:[%s2812_s5 + $0xa8] sm:$0xff] }
  0x58   :  { %v1286_v12 = vld [vmem:[%s2812_s5 + $0xb0] sm:$0xff]  ;;  %v1287_v13 = vld [vmem:[%s2812_s5 + $0xb8] sm:$0xff]  ;;  %v1288_v14 = vld [vmem:[%s2812_s5 + $0xc0] sm:$0xff] }
  0x59   :  { %v1289_v15 = vld [vmem:[%s2812_s5 + $0xc8] sm:$0xff]  ;;  %v747_v16 = vld [vmem:[%s2811_s4 + $0xe0] sm:$0xff] }
  0x5a   :  { %1831 = vmatmul.mubr.msk.f32.gmra.mrb[10].mxu0 %vm269_vm0, %v40_v17  ;;  %813 = vperm.xlu0 %1929, %v731_v19   ;;  %v1290_v17 = vld [vmem:[%s2812_s5 + $0xd0] sm:$0xff]  ;;  %v1291_v19 = vld [vmem:[%s2812_s5 + $0xd8] sm:$0xff] }
  0x5b   :  { %1833 = vmatprep.mubr.msk.f32.mxu0 %vm269_vm0, %v41_v18  ;;  %818 = vperm.xlu1 %1930, %v732_v20   ;;  %v748_v18 = vld [vmem:[%s2811_s4 + $0xe8] sm:$0xff]  ;;  %v749_v20 = vld [vmem:[%s2811_s4 + $0xf0] sm:$0xff] }
  0x5e   :  { %1834 = vmatmul.mubr.msk.f32.gmra.mrb[12].mxu0 %vm269_vm0, %v42_v21  ;;  %823 = vperm.xlu0 %1929, %v733_v23   ;;  %v1292_v21 = vld [vmem:[%s2812_s5 + $0xe0] sm:$0xff]  ;;  %v1293_v23 = vld [vmem:[%s2812_s5 + $0xe8] sm:$0xff] }
  0x5f   :  { %1836 = vmatprep.mubr.msk.f32.mxu0 %vm269_vm0, %v43_v22  ;;  %828 = vperm.xlu1 %1930, %v734_v24   ;;  %v750_v22 = vld [vmem:[%s2811_s4 + $0xf8] sm:$0xff]  ;;  %v1294_v24 = vld [vmem:[%s2812_s5 + $0xf0] sm:$0xff] }
  0x62   :  { %1837 = vmatmul.mubr.msk.f32.gmra.mrb[14].mxu0 %vm269_vm0, %v44_v25  ;;  %833 = vperm.xlu0 %1929, %v735_v27   ;;  %v1295_v25 = vld [vmem:[%s2812_s5 + $0xf8] sm:$0xff] }
  0x63   :  { %1839 = vmatprep.mubr.msk.f32.mxu0 %vm269_vm0, %v45_v26  ;;  %838 = vperm.xlu1 %1930, %v736_v28   ;;  %v1933_v28 = vld [vmem:[%s2810_s3 + $0x4] ss:$8 sps:$4 sm:$0xff]  }
  0x66   :  { %1840 = vmatmul.mubr.msk.f32.gmra.mrb[16].mxu0 %vm269_vm0, %v46_v29  ;;  %843 = vperm.xlu0 %1929, %v737_v31   ;;  %v1936_v29 = vld [vmem:[%s2810_s3 + $0x24] ss:$8 sps:$4 sm:$0xff]  }
  0x67   :  { %1842 = vmatprep.mubr.msk.f32.mxu0 %vm269_vm0, %v47_v30  ;;  %848 = vperm.xlu1 %1930, %v738_v32  }
  0x68   :  { %1119 = vmatprep.mubr.bf16.mxu1 %v1936_v29 }
  0x6a   :  { %1843 = vmatmul.mubr.msk.f32.gmra.mrb[18].mxu0 %vm269_vm0, %v48_v33  ;;  %853 = vperm.xlu0 %1929, %v739_v35  }
  0x6b   :  { %1845 = vmatprep.mubr.msk.f32.mxu0 %vm269_vm0, %v49_v34  ;;  %858 = vperm.xlu1 %1930, %v740_v36  }
  0x6e   :  { %1846 = vmatmul.mubr.msk.f32.gmra.mrb[20].mxu0 %vm269_vm0, %v50_v37  ;;  %863 = vperm.xlu0 %1929, %v741_v39  }
  0x6f   :  { %1848 = vmatprep.mubr.msk.f32.mxu0 %vm269_vm0, %v51_v38  ;;  %868 = vperm.xlu1 %1930, %v742_v40  }
  0x72   :  { %1849 = vmatmul.mubr.msk.f32.gmra.mrb[22].mxu0 %vm269_vm0, %v52_v41  ;;  %873 = vperm.xlu0 %1929, %v743_v43  }
  0x73   :  { %1851 = vmatprep.mubr.msk.f32.mxu0 %vm269_vm0, %v53_v42  ;;  %878 = vperm.xlu1 %1930, %v744_v44  }
  0x76   :  { %1852 = vmatmul.mubr.msk.f32.gmra.mrb[24].mxu0 %vm269_vm0, %v54_v45  ;;  %883 = vperm.xlu0 %1929, %v745_v47  }
  0x77   :  { %1854 = vmatprep.mubr.msk.f32.mxu0 %vm269_vm0, %v55_v46  ;;  %888 = vperm.xlu1 %1930, %v746_v48  }
  0x7a   :  { %1855 = vmatmul.mubr.msk.f32.gmra.mrb[26].mxu0 %vm269_vm0, %v56_v49  ;;  %1298 = vperm.xlu0 %1929, %v1264_v51  }
  0x7b   :  { %1857 = vmatprep.mubr.msk.f32.mxu0 %vm269_vm0, %v57_v50  ;;  %1303 = vperm.xlu1 %1930, %v1265_v52  }
  0x7e   :  { %1858 = vmatmul.mubr.msk.f32.gmra.mrb[28].mxu0 %vm269_vm0, %v58_v53  ;;  %1308 = vperm.xlu0 %1929, %v1266_v55  }
  0x7f   :  { %1860 = vmatprep.mubr.msk.f32.mxu0 %vm269_vm0, %v59_v54  ;;  %1313 = vperm.xlu1 %1930, %v1267_v56  }
  0x81   :  { %v2547_v27 = vpop.permute.xlu0 %191 }
  0x82   :  { %1861 = vmatmul.mubr.msk.f32.gmra.mrb[30].mxu0 %vm269_vm0, %v60_v57  ;;  %1318 = vperm.xlu0 %1929, %v1268_v58   ;;  %v112_v26 = vpop.permute.xlu1 %111 }
  0x83   :  { %1323 = vperm.xlu1 %1930, %v1269_v59   ;;  %1103 = vmatprep.mubr.bf16.mxu0 %v1933_v28 }
  0x85   :  { %v2555_v31 = vpop.permute.xlu0 %196 }
  0x86   :  { %1328 = vperm.xlu0 %1929, %v1270_v60   ;;  %v117_v30 = vpop.permute.xlu1 %116 }
  0x87   :  { %1333 = vperm.xlu1 %1930, %v1271_v61  }
  0x89   :  { %v2559_v33 = vpop.permute.xlu0 %201 }
  0x8a   :  { %1338 = vperm.xlu0 %1929, %v1272_v62   ;;  %v2557_v32 = vpop.permute.xlu1 %206 }
  0x8b   :  { %1343 = vperm.xlu1 %1930, %v1273_v63  }
  0x8d   :  { %v122_v35 = vpop.permute.xlu0 %121 }
  0x8e   :  { %1348 = vperm.xlu0 %1929, %v1274_v0   ;;  %v127_v34 = vpop.permute.xlu1 %126 }
  0x8f   :  { %1353 = vperm.xlu1 %1930, %v1275_v1  }
  0x91   :  { %v2563_v37 = vpop.permute.xlu0 %211 }
  0x92   :  { %1358 = vperm.xlu0 %1929, %v1276_v2   ;;  %v2561_v36 = vpop.permute.xlu1 %216 }
  0x93   :  { %1363 = vperm.xlu1 %1930, %v1277_v3  }
  0x95   :  { %v132_v39 = vpop.permute.xlu0 %131 }
  0x96   :  { %1368 = vperm.xlu0 %1929, %v1278_v4   ;;  %v137_v38 = vpop.permute.xlu1 %136 }
  0x97   :  { %1373 = vperm.xlu1 %1930, %v1279_v5  }
  0x99   :  { %v2567_v41 = vpop.permute.xlu0 %221 }
  0x9a   :  { %1378 = vperm.xlu0 %1929, %v1280_v6   ;;  %v2565_v40 = vpop.permute.xlu1 %226 }
  0x9b   :  { %1383 = vperm.xlu1 %1930, %v1281_v7  }
  0x9d   :  { %v142_v43 = vpop.permute.xlu0 %141 }
  0x9e   :  { %1388 = vperm.xlu0 %1929, %v1282_v8   ;;  %v147_v42 = vpop.permute.xlu1 %146 }
  0x9f   :  { %1393 = vperm.xlu1 %1930, %v1283_v9  }
  0xa1   :  { %v2571_v45 = vpop.permute.xlu0 %231 }
  0xa2   :  { %1398 = vperm.xlu0 %1929, %v1284_v10   ;;  %v2569_v44 = vpop.permute.xlu1 %236 }
  0xa3   :  { %1403 = vperm.xlu1 %1930, %v1285_v11  }
  0xa5   :  { %v152_v47 = vpop.permute.xlu0 %151 }
  0xa6   :  { %1408 = vperm.xlu0 %1929, %v1286_v12   ;;  %v157_v46 = vpop.permute.xlu1 %156 }
  0xa7   :  { %1413 = vperm.xlu1 %1930, %v1287_v13  }
  0xa9   :  { %v2575_v49 = vpop.permute.xlu0 %241 }
  0xaa   :  { %1418 = vperm.xlu0 %1929, %v1288_v14   ;;  %v2573_v48 = vpop.permute.xlu1 %246 }
  0xab   :  { %1423 = vperm.xlu1 %1930, %v1289_v15  }
  0xad   :  { %v162_v58 = vpop.permute.xlu0 %161 }
  0xae   :  { %893 = vperm.xlu0 %1929, %v747_v16   ;;  %v167_v55 = vpop.permute.xlu1 %166 }
  0xaf   :  { %1428 = vperm.xlu1 %1930, %v1290_v17  }
  0xb1   :  { %v2583_v7 = vpop.permute.xlu0 %251 }
  0xb2   :  { %898 = vperm.xlu0 %1929, %v748_v18   ;;  %v2579_v4 = vpop.permute.xlu1 %256 }
  0xb3   :  { %1433 = vperm.xlu1 %1930, %v1291_v19  }
  0xb5   :  { %v172_v19 = vpop.permute.xlu0 %171 }
  0xb6   :  { %903 = vperm.xlu0 %1929, %v749_v20   ;;  %v177_v16 = vpop.permute.xlu1 %176 }
  0xb7   :  { %1438 = vperm.xlu1 %1930, %v1292_v21  }
  0xba   :  { %908 = vperm.xlu0 %1929, %v750_v22  }
  0xbb   :  { %1443 = vperm.xlu1 %1930, %v1293_v23  }
  0xbe   :  { %1448 = vperm.xlu0 %1929, %v1294_v24  }
  0xbf   :  { %1453 = vperm.xlu1 %1930, %v1295_v25  }
 0x119   :  { %v1817_v50 = vpop.f32.mrb[0].mxu0 }
 0x11a   :  { %v486_v51 = vadd.f32 %v1817_v50, %v117_v30  ;;  %v480_v52 = vpop.f32.mrb[1].mxu0  ;;  %v2589_v30 = vpop.permute.xlu1 %266 }
 0x11b   :  { %v481_v53 = vadd.f32 %v480_v52, %v112_v26 }
 0x11c   :  { %v640_v54 = vmax.f32 %v486_v51, 0.0 }
 0x11d   :  { %v639_v56 = vmax.f32 %v481_v53, 0.0  ;;  %v1820_v57 = vpop.f32.mrb[2].mxu0 }
 0x11e   :  { %v496_v59 = vadd.f32 %v1820_v57, %v127_v34  ;;  %v490_v60 = vpop.f32.mrb[3].mxu0  ;;  %v187_v53 = vpop.permute.xlu1 %186 }
 0x11f   :  { %v2577_v61 = vpack.c.bf16 %v640_v54, %v639_v56  ;;  %v491_v62 = vadd.f32 %v490_v60, %v122_v35 }
 0x120   :  { %v642_v63 = vmax.f32 %v496_v59, 0.0 }
 0x121   :  { %v641_v0 = vmax.f32 %v491_v62, 0.0  ;;  %v1823_v1 = vpop.f32.mrb[4].mxu0 }
 0x122   :  { %v506_v2 = vadd.f32 %v1823_v1, %v137_v38  ;;  %v500_v3 = vpop.f32.mrb[5].mxu0  ;;  %v2593_v38 = vpop.permute.xlu0 %261 }
 0x123   :  { %v2581_v5 = vpack.c.bf16 %v642_v63, %v641_v0  ;;  %v501_v6 = vadd.f32 %v500_v3, %v132_v39 }
 0x124   :  { %v644_v8 = vmax.f32 %v506_v2, 0.0 }
 0x125   :  { %v643_v9 = vmax.f32 %v501_v6, 0.0  ;;  %v1826_v10 = vpop.f32.mrb[6].mxu0 }
 0x126   :  { %v516_v11 = vadd.f32 %v1826_v10, %v147_v42  ;;  %v510_v12 = vpop.f32.mrb[7].mxu0  ;;  %v182_v56 = vpop.permute.xlu0 %181 }
 0x127   :  { %v2585_v13 = vpack.c.bf16 %v644_v8, %v643_v9  ;;  %v511_v14 = vadd.f32 %v510_v12, %v142_v43 }
 0x128   :  { %v646_v15 = vmax.f32 %v516_v11, 0.0 }
 0x129   :  { %v645_v17 = vmax.f32 %v511_v14, 0.0  ;;  %v1829_v18 = vpop.f32.mrb[8].mxu0 }
 0x12a   :  { %v526_v20 = vadd.f32 %v1829_v18, %v157_v46  ;;  %v520_v21 = vpop.f32.mrb[9].mxu0 }
 0x12b   :  { %v2587_v22 = vpack.c.bf16 %v646_v15, %v645_v17  ;;  %v521_v23 = vadd.f32 %v520_v21, %v152_v47 }
 0x12c   :  { %v648_v24 = vmax.f32 %v526_v20, 0.0 }
 0x12d   :  { %v647_v25 = vmax.f32 %v521_v23, 0.0  ;;  %v1832_v26 = vpop.f32.mrb[10].mxu0 }
 0x12e   :  { %v536_v28 = vadd.f32 %v1832_v26, %v167_v55  ;;  %v530_v29 = vpop.f32.mrb[11].mxu0 }
 0x12f   :  { %v2591_v34 = vpack.c.bf16 %v648_v24, %v647_v25  ;;  %v531_v35 = vadd.f32 %v530_v29, %v162_v58 }
 0x130   :  { %v650_v39 = vmax.f32 %v536_v28, 0.0 }
 0x131   :  { %v649_v42 = vmax.f32 %v531_v35, 0.0  ;;  %v1835_v43 = vpop.f32.mrb[12].mxu0 }
 0x132   :  { %v546_v46 = vadd.f32 %v1835_v43, %v177_v16  ;;  %v540_v50 = vpop.f32.mrb[13].mxu0 }
 0x133   :  { %v2595_v51 = vpack.c.bf16 %v650_v39, %v649_v42  ;;  %v541_v47 = vadd.f32 %v540_v50, %v172_v19 }
 0x134   :  { %v652_v52 = vmax.f32 %v546_v46, 0.0 }
 0x135   :  { %v651_v54 = vmax.f32 %v541_v47, 0.0  ;;  %v1838_v55 = vpop.f32.mrb[14].mxu0 }
 0x136   :  { %v556_v57 = vadd.f32 %v1838_v55, %v187_v53  ;;  %v550_v59 = vpop.f32.mrb[15].mxu0 }
 0x137   :  { %v2597_v60 = vpack.c.bf16 %v652_v52, %v651_v54  ;;  %v551_v58 = vadd.f32 %v550_v59, %v182_v56 }
 0x138   :  { %v654_v62 = vmax.f32 %v556_v57, 0.0 }
 0x139   :  { %v653_v63 = vmax.f32 %v551_v58, 0.0  ;;  %v1841_v0 = vpop.f32.mrb[16].mxu0  ;;  %v1941_v58 = vld [vmem:[%s2810_s3 + $0x10] ss:$8 sps:$4 sm:$0xff]  }
 0x13a   :  { %v566_v1 = vadd.f32 %v1841_v0, %v2555_v31  ;;  %v560_v2 = vpop.f32.mrb[17].mxu0  ;;  %v1945_v0 = vld [vmem:[%s2810_s3 + $0x40] ss:$8 sps:$4 sm:$0xff]  }
 0x13b   :  { %v2600_v3 = vpack.c.bf16 %v654_v62, %v653_v63  ;;  %v561_v6 = vadd.f32 %v560_v2, %v2547_v27  ;;  %v1942_v62 = vld [vmem:[%s2810_s3 + $0x30] ss:$8 sps:$4 sm:$0xff]   ;;  %v1943_v63 = vld [vmem:[%s2810_s3 + $0x44] ss:$8 sps:$4 sm:$0xff]  }
 0x13c   :  { %v656_v8 = vmax.f32 %v566_v1, 0.0  ;;  %v1946_v1 = vld [vmem:[%s2810_s3 + $0x54] ss:$8 sps:$4 sm:$0xff]   ;;  %v1948_v2 = vld [vmem:[%s2810_s3 + $0x50] ss:$8 sps:$4 sm:$0xff]  }
 0x13d   :  { %v655_v9 = vmax.f32 %v561_v6, 0.0  ;;  %v1844_v10 = vpop.f32.mrb[18].mxu0  ;;  %v1951_v6 = vld [vmem:[%s2810_s3 + $0x60] ss:$8 sps:$4 sm:$0xff]  }
 0x13e   :  { %v576_v11 = vadd.f32 %v1844_v10, %v2557_v32  ;;  %v570_v12 = vpop.f32.mrb[19].mxu0  ;;  %v1955_v10 = vld [vmem:[%s2810_s3 + $0x84] ss:$8 sps:$4 sm:$0xff]  }
 0x13f   :  { %v711_v14 = vpack.c.bf16 %v656_v8, %v655_v9  ;;  %v571_v15 = vadd.f32 %v570_v12, %v2559_v33  ;;  %v1952_v8 = vld [vmem:[%s2810_s3 + $0x74] ss:$8 sps:$4 sm:$0xff]   ;;  %v1954_v9 = vld [vmem:[%s2810_s3 + $0x70] ss:$8 sps:$4 sm:$0xff]  }
 0x140   :  { %v658_v16 = vmax.f32 %v576_v11, 0.0  ;;  %v1957_v11 = vld [vmem:[%s2810_s3 + $0x80] ss:$8 sps:$4 sm:$0xff]   ;;  %v1958_v12 = vld [vmem:[%s2810_s3 + $0x94] ss:$8 sps:$4 sm:$0xff]  }
 0x141   :  { %v657_v17 = vmax.f32 %v571_v15, 0.0  ;;  %v1847_v18 = vpop.f32.mrb[20].mxu0  ;;  %1671 = vmatprep.subr.bf16.mxu0 %v711_v14  ;;  %1911 = vmatprep.subr.bf16.mxu1 %v711_v14  ;;  %v1960_v14 = vld [vmem:[%s2810_s3 + $0x90] ss:$8 sps:$4 sm:$0xff]   ;;  %v1961_v15 = vld [vmem:[%s2810_s3 + $0xa4] ss:$8 sps:$4 sm:$0xff]  }
 0x142   :  { %v586_v31 = vadd.f32 %v1847_v18, %v2561_v36  ;;  %v580_v19 = vpop.f32.mrb[21].mxu0  ;;  %1672 = vmatpush3.bf16.msra.mxu0 %v2577_v61  ;;  %1919 = vmatpush3.bf16.msra.mxu1 %v2577_v61  ;;  %v1966_v18 = vld [vmem:[%s2810_s3 + $0xb0] ss:$8 sps:$4 sm:$0xff]  }
 0x143   :  { %v712_v27 = vpack.c.bf16 %v658_v16, %v657_v17  ;;  %v581_v20 = vadd.f32 %v580_v19, %v2563_v37  ;;  %v1963_v16 = vld [vmem:[%s2810_s3 + $0xa0] ss:$8 sps:$4 sm:$0xff]   ;;  %v1964_v17 = vld [vmem:[%s2810_s3 + $0xb4] ss:$8 sps:$4 sm:$0xff]  }
 0x144   :  { %v660_v32 = vmax.f32 %v586_v31, 0.0  ;;  %v1967_v31 = vld [vmem:[%s2810_s3 + $0xc4] ss:$8 sps:$4 sm:$0xff]   ;;  %v1969_v19 = vld [vmem:[%s2810_s3 + $0xc0] ss:$8 sps:$4 sm:$0xff]  }
 0x145   :  { %v659_v21 = vmax.f32 %v581_v20, 0.0  ;;  %v1850_v23 = vpop.f32.mrb[22].mxu0  ;;  %1673 = vmatprep.subr.bf16.mxu0 %v712_v27  ;;  %1912 = vmatprep.subr.bf16.mxu1 %v712_v27  ;;  %v1970_v27 = vld [vmem:[%s2810_s3 + $0xd4] ss:$8 sps:$4 sm:$0xff]   ;;  %v1972_v20 = vld [vmem:[%s2810_s3 + $0xd0] ss:$8 sps:$4 sm:$0xff]  }
 0x146   :  { %v596_v33 = vadd.f32 %v1850_v23, %v2565_v40  ;;  %v590_v24 = vpop.f32.mrb[23].mxu0  ;;  %1674 = vmatpush3.bf16.msra.mxu0 %v2581_v5  ;;  %1920 = vmatpush3.bf16.msra.mxu1 %v2581_v5  ;;  %v1976_v23 = vld [vmem:[%s2810_s3 + $0xf4] ss:$8 sps:$4 sm:$0xff]  }
 0x147   :  { %v713_v36 = vpack.c.bf16 %v660_v32, %v659_v21  ;;  %v591_v25 = vadd.f32 %v590_v24, %v2567_v41  ;;  %v1973_v32 = vld [vmem:[%s2810_s3 + $0xe4] ss:$8 sps:$4 sm:$0xff]   ;;  %v1975_v21 = vld [vmem:[%s2810_s3 + $0xe0] ss:$8 sps:$4 sm:$0xff]   ;;  %v754_v24 = vpop.permute.xlu0 %753 }
 0x148   :  { %v662_v26 = vmax.f32 %v596_v33, 0.0  ;;  %v1978_v33 = vld [vmem:[%s2810_s3 + $0xf0] ss:$8 sps:$4 sm:$0xff]  }
 0x149   :  { %v661_v61 = vmax.f32 %v591_v25, 0.0  ;;  %v1853_v28 = vpop.f32.mrb[24].mxu0  ;;  %1675 = vmatprep.subr.bf16.mxu0 %v713_v36  ;;  %1913 = vmatprep.subr.bf16.mxu1 %v713_v36  ;;  %v759_v36 = vpop.permute.xlu1 %758 }
 0x14a   :  { %v606_v37 = vadd.f32 %v1853_v28, %v2569_v44  ;;  %v600_v29 = vpop.f32.mrb[25].mxu0  ;;  %1676 = vmatpush3.bf16.msra.mxu0 %v2585_v13  ;;  %1921 = vmatpush3.bf16.msra.mxu1 %v2585_v13 }
 0x14b   :  { %v714_v40 = vpack.c.bf16 %v662_v26, %v661_v61  ;;  %v601_v35 = vadd.f32 %v600_v29, %v2571_v45  ;;  %v764_v25 = vpop.permute.xlu0 %763 }
 0x14c   :  { %v664_v39 = vmax.f32 %v606_v37, 0.0 }
 0x14d   :  { %v663_v5 = vmax.f32 %v601_v35, 0.0  ;;  %v1856_v42 = vpop.f32.mrb[26].mxu0  ;;  %1677 = vmatprep.subr.bf16.mxu0 %v714_v40  ;;  %1914 = vmatprep.subr.bf16.mxu1 %v714_v40  ;;  %v2723_v26 = vpop.permute.xlu1 %768 }
 0x14e   :  { %v616_v41 = vadd.f32 %v1856_v42, %v2573_v48  ;;  %v610_v43 = vpop.f32.mrb[27].mxu0  ;;  %1678 = vmatpush3.bf16.msra.mxu0 %v2587_v22  ;;  %1922 = vmatpush3.bf16.msra.mxu1 %v2587_v22 }
 0x14f   :  { %v715_v44 = vpack.c.bf16 %v664_v39, %v663_v5  ;;  %v611_v46 = vadd.f32 %v610_v43, %v2575_v49  ;;  %v774_v61 = vpop.permute.xlu0 %773 }
 0x150   :  { %v666_v50 = vmax.f32 %v616_v41, 0.0 }
 0x151   :  { %v665_v13 = vmax.f32 %v611_v46, 0.0  ;;  %v1859_v47 = vpop.f32.mrb[28].mxu0  ;;  %1679 = vmatprep.subr.bf16.mxu0 %v715_v44  ;;  %1915 = vmatprep.subr.bf16.mxu1 %v715_v44  ;;  %v779_v28 = vpop.permute.xlu1 %778 }
 0x152   :  { %v626_v45 = vadd.f32 %v1859_v47, %v2579_v4  ;;  %v620_v52 = vpop.f32.mrb[29].mxu0  ;;  %1680 = vmatpush3.bf16.msra.mxu0 %v2591_v34  ;;  %1923 = vmatpush3.bf16.msra.mxu1 %v2591_v34 }
 0x153   :  { %v716_v48 = vpack.c.bf16 %v666_v50, %v665_v13  ;;  %v621_v53 = vadd.f32 %v620_v52, %v2583_v7  ;;  %v2725_v37 = vpop.permute.xlu0 %783 }
 0x154   :  { %v668_v54 = vmax.f32 %v626_v45, 0.0 }
 0x155   :  { %v667_v22 = vmax.f32 %v621_v53, 0.0  ;;  %v1862_v55 = vpop.f32.mrb[30].mxu0  ;;  %1681 = vmatprep.subr.bf16.mxu0 %v716_v48  ;;  %1916 = vmatprep.subr.bf16.mxu1 %v716_v48  ;;  %v2727_v29 = vpop.permute.xlu1 %788 }
 0x156   :  { %v636_v49 = vadd.f32 %v1862_v55, %v2589_v30  ;;  %v630_v56 = vpop.f32.mrb[31].mxu0  ;;  %1682 = vmatpush3.bf16.msra.mxu0 %v2595_v51  ;;  %1924 = vmatpush3.bf16.msra.mxu1 %v2595_v51  ;;  %v1931_v30 = vld [vmem:[%s2810_s3] ss:$8 sps:$4 sm:$0xff]  }
 0x157   :  { %v717_v4 = vpack.c.bf16 %v668_v54, %v667_v22  ;;  %v631_v57 = vadd.f32 %v630_v56, %v2593_v38  ;;  %v1934_v51 = vld [vmem:[%s2810_s3 + $0x20] ss:$8 sps:$4 sm:$0xff]   ;;  %v1937_v38 = vld [vmem:[%s2810_s3 + $0x14] ss:$8 sps:$4 sm:$0xff]   ;;  %v2729_v40 = vpop.permute.xlu0 %793 }
 0x158   :  { %v670_v59 = vmax.f32 %v636_v49, 0.0 }
 0x159   :  { %v669_v34 = vmax.f32 %v631_v57, 0.0  ;;  %1683 = vmatprep.subr.bf16.mxu0 %v717_v4  ;;  %1917 = vmatprep.subr.bf16.mxu1 %v717_v4  ;;  %v2731_v35 = vpop.permute.xlu1 %798 }
 0x15a   :  { %1684 = vmatpush3.bf16.msra.mxu0 %v2597_v60  ;;  %1925 = vmatpush3.bf16.msra.mxu1 %v2597_v60  ;;  %v1939_v60 = vld [vmem:[%s2810_s3 + $0x34] ss:$8 sps:$4 sm:$0xff]  }
 0x15b   :  { %v718_v7 = vpack.c.bf16 %v670_v59, %v669_v34  ;;  %v2733_v39 = vpop.permute.xlu0 %803 }
 0x15d   :  { %1685 = vmatprep.subr.bf16.mxu0 %v718_v7  ;;  %1918 = vmatprep.subr.bf16.mxu1 %v718_v7  ;;  %v2735_v5 = vpop.permute.xlu1 %808 }
 0x15e   :  { %1686 = vmatpush3.bf16.msra.mxu0 %v2600_v3  ;;  %1926 = vmatpush3.bf16.msra.mxu1 %v2600_v3  ;;  %v1949_v3 = vld [vmem:[%s2810_s3 + $0x64] ss:$8 sps:$4 sm:$0xff]  }
 0x15f   :  { %v2737_v42 = vpop.permute.xlu0 %813 }
 0x161   :  { %1104 = vmatmul.mubr.bf16.vlgmr.msra.gmra.mrb[32].mxu0 %v1931_v30  ;;  %1120 = vmatmul.mubr.bf16.vlgmr.msra.gmra.mrb[0].mxu1 %v1934_v51  ;;  %v2739_v41 = vpop.permute.xlu1 %818 }
 0x162   :  { %1111 = vmatprep.mubr.bf16.mxu0 %v1937_v38  ;;  %1127 = vmatprep.mubr.bf16.mxu1 %v1939_v60 }
 0x163   :  { %v2741_v43 = vpop.permute.xlu0 %823 }
 0x165   :  { %v2743_v44 = vpop.permute.xlu1 %828 }
 0x167   :  { %v2745_v46 = vpop.permute.xlu0 %833 }
 0x169   :  { %1112 = vmatmul.mubr.bf16.gmra.mrb[36].mxu0 %v1941_v58  ;;  %1128 = vmatmul.mubr.bf16.gmra.mrb[4].mxu1 %v1942_v62  ;;  %v2747_v50 = vpop.permute.xlu1 %838 }
 0x16a   :  { %1135 = vmatprep.mubr.bf16.mxu1 %v1943_v63 }
 0x16b   :  { %v2749_v13 = vpop.permute.xlu0 %843 }
 0x16d   :  { %v2751_v47 = vpop.permute.xlu1 %848 }
 0x16f   :  { %v2753_v45 = vpop.permute.xlu0 %853 }
 0x171   :  { %1136 = vmatmul.mubr.bf16.gmra.mrb[8].mxu1 %v1945_v0  ;;  %v2755_v52 = vpop.permute.xlu1 %858 }
 0x172   :  { %1143 = vmatprep.mubr.bf16.mxu1 %v1946_v1 }
 0x173   :  { %v2757_v48 = vpop.permute.xlu0 %863 }
 0x175   :  { %v2759_v53 = vpop.permute.xlu1 %868 }
 0x177   :  { %v2761_v54 = vpop.permute.xlu0 %873 }
 0x179   :  { %1144 = vmatmul.mubr.bf16.gmra.mrb[12].mxu1 %v1948_v2  ;;  %v2763_v22 = vpop.permute.xlu1 %878 }
 0x17a   :  { %1151 = vmatprep.mubr.bf16.mxu1 %v1949_v3 }
 0x17b   :  { %v2765_v55 = vpop.permute.xlu0 %883 }
 0x17d   :  { %v2767_v49 = vpop.permute.xlu1 %888 }
 0x17f   :  { %v1299_v56 = vpop.permute.xlu0 %1298 }
 0x181   :  { %1152 = vmatmul.mubr.bf16.gmra.mrb[16].mxu1 %v1951_v6  ;;  %v1304_v4 = vpop.permute.xlu1 %1303 }
 0x182   :  { %1159 = vmatprep.mubr.bf16.mxu1 %v1952_v8 }
 0x183   :  { %v1309_v6 = vpop.permute.xlu0 %1308 }
 0x185   :  { %v1314_v8 = vpop.permute.xlu1 %1313 }
 0x189   :  { %1160 = vmatmul.mubr.bf16.gmra.mrb[20].mxu1 %v1954_v9 }
 0x18a   :  { %1167 = vmatprep.mubr.bf16.mxu1 %v1955_v10 }
 0x191   :  { %1168 = vmatmul.mubr.bf16.gmra.mrb[24].mxu1 %v1957_v11 }
 0x192   :  { %1175 = vmatprep.mubr.bf16.mxu1 %v1958_v12 }
 0x199   :  { %1176 = vmatmul.mubr.bf16.gmra.mrb[28].mxu1 %v1960_v14 }
 0x19a   :  { %1183 = vmatprep.mubr.bf16.mxu1 %v1961_v15 }
 0x1a1   :  { %1184 = vmatmul.mubr.bf16.gmra.mrb[32].mxu1 %v1963_v16 }
 0x1a2   :  { %1191 = vmatprep.mubr.bf16.mxu1 %v1964_v17 }
 0x1a9   :  { %1192 = vmatmul.mubr.bf16.gmra.mrb[36].mxu1 %v1966_v18 }
 0x1aa   :  { %1199 = vmatprep.mubr.bf16.mxu1 %v1967_v31 }
 0x1b1   :  { %1200 = vmatmul.mubr.bf16.gmra.mrb[40].mxu1 %v1969_v19 }
 0x1b2   :  { %1207 = vmatprep.mubr.bf16.mxu1 %v1970_v27 }
 0x1b9   :  { %1208 = vmatmul.mubr.bf16.gmra.mrb[44].mxu1 %v1972_v20 }
 0x1ba   :  { %1215 = vmatprep.mubr.bf16.mxu1 %v1973_v32 }
 0x1c1   :  { %1216 = vmatmul.mubr.bf16.gmra.mrb[48].mxu1 %v1975_v21 }
 0x1c2   :  { %1223 = vmatprep.mubr.bf16.mxu1 %v1976_v23 }
 0x1c9   :  { %1224 = vmatmul.mubr.bf16.gmra.mrb[52].mxu1 %v1978_v33 }
 0x234   :  { %v1687_v57 = vpop.f32.mrb[32].mxu0  ;;  %v1699_v59 = vpop.f32.mrb[0].mxu1 }
 0x235   :  { %v1688_v34 = vpop.f32.mrb[33].mxu0  ;;  %v1700_v7 = vpop.f32.mrb[1].mxu1 }
 0x236   :  { %v1689_v30 = vadd.f32 %v1688_v34, %v1687_v57  ;;  %v1701_v51 = vadd.f32 %v1700_v7, %v1699_v59  ;;  %v1690_v38 = vpop.f32.mrb[34].mxu0  ;;  %v1702_v60 = vpop.f32.mrb[2].mxu1 }
 0x237   :  { %v1691_v58 = vpop.f32.mrb[35].mxu0  ;;  %v1703_v62 = vpop.f32.mrb[3].mxu1 }
 0x238   :  { %v1106_v63 = vadd.f32 %v1689_v30, %v754_v24  ;;  %v1692_v0 = vadd.f32 %v1691_v58, %v1690_v38  ;;  %v1704_v1 = vadd.f32 %v1703_v62, %v1702_v60  ;;  %v1122_v27 = vadd.f32 %v1701_v51, %v774_v61  ;;  %v1319_v24 = vpop.permute.xlu0 %1318  ;;  %v1324_v7 = vpop.permute.xlu1 %1323 }
 0x23a   :  { %v1232_v2 = vmax.f32 %v1106_v63, 0.0  ;;  %v1109_v3 = vadd.f32 %v1692_v0, %v759_v36  ;;  %v1125_v36 = vadd.f32 %v1704_v1, %v779_v28  ;;  %v1236_v30 = vmax.f32 %v1122_v27, 0.0 }
 0x23c   :  { %v1233_v9 = vmax.f32 %v1109_v3, 0.0  ;;  %v1693_v10 = vpop.f32.mrb[36].mxu0  ;;  %v1705_v11 = vpop.f32.mrb[4].mxu1  ;;  %v1456_v15 = vmul.f32 %v1299_v56, %v1232_v2  ;;  %v1237_v58 = vmax.f32 %v1125_v36, 0.0  ;;  %v1460_v1 = vmul.f32 %v1319_v24, %v1236_v30 }
 0x23d   :  { %v1694_v12 = vpop.f32.mrb[37].mxu0  ;;  %v1706_v14 = vpop.f32.mrb[5].mxu1 }
 0x23e   :  { %v1457_v16 = vmul.f32 %v1304_v4, %v1233_v9  ;;  %v1695_v17 = vadd.f32 %v1694_v12, %v1693_v10  ;;  %v1707_v18 = vadd.f32 %v1706_v14, %v1705_v11  ;;  %v1696_v31 = vpop.f32.mrb[38].mxu0  ;;  %v1708_v19 = vpop.f32.mrb[6].mxu1 }
 0x23f   :  { %v1697_v20 = vpop.f32.mrb[39].mxu0  ;;  %v1709_v32 = vpop.f32.mrb[7].mxu1 }
 0x240   :  { %v1488_v21 = vadd.f32 %v1457_v16, %v1456_v15  ;;  %v1114_v23 = vadd.f32 %v1695_v17, %v764_v25  ;;  %v1698_v33 = vadd.f32 %v1697_v20, %v1696_v31  ;;  %v1710_v57 = vadd.f32 %v1709_v32, %v1708_v19  ;;  %v1329_v28 = vpop.permute.xlu0 %1328  ;;  %v1334_v10 = vpop.permute.xlu1 %1333 }
 0x241   :  { %v1130_v4 = vadd.f32 %v1707_v18, %v2725_v37  ;;  %v1461_v37 = vmul.f32 %v1324_v7, %v1237_v58 }
 0x242   :  { %v1234_v59 = vmax.f32 %v1114_v23, 0.0  ;;  %v1117_v34 = vadd.f32 %v1698_v33, %v2723_v26  ;;  %v1133_v25 = vadd.f32 %v1710_v57, %v2727_v29 }
 0x243   :  { %v1238_v3 = vmax.f32 %v1130_v4, 0.0 }
 0x244   :  { %v1458_v56 = vmul.f32 %v1309_v6, %v1234_v59  ;;  %v1235_v38 = vmax.f32 %v1117_v34, 0.0  ;;  %v1711_v60 = vpop.f32.mrb[8].mxu1  ;;  %v1239_v12 = vmax.f32 %v1133_v25, 0.0  ;;  %v1339_v17 = vpop.permute.xlu0 %1338 }
 0x245   :  { %v1712_v61 = vpop.f32.mrb[9].mxu1  ;;  %v1462_v15 = vmul.f32 %v1329_v28, %v1238_v3 }
 0x246   :  { %v1489_v51 = vadd.f32 %v1488_v21, %v1458_v56  ;;  %v1459_v62 = vmul.f32 %v1314_v8, %v1235_v38  ;;  %v1713_v63 = vadd.f32 %v1712_v61, %v1711_v60  ;;  %v1714_v0 = vpop.f32.mrb[10].mxu1  ;;  %v1463_v31 = vmul.f32 %v1334_v10, %v1239_v12  ;;  %v1344_v21 = vpop.permute.xlu1 %1343 }
 0x247   :  { %v1715_v2 = vpop.f32.mrb[11].mxu1 }
 0x248   :  { %v1490_v26 = vadd.f32 %v1489_v51, %v1459_v62  ;;  %v1138_v9 = vadd.f32 %v1713_v63, %v2729_v40  ;;  %v1716_v6 = vadd.f32 %v1715_v2, %v1714_v0  ;;  %v1349_v7 = vpop.permute.xlu0 %1348 }
 0x24a   :  { %v1491_v11 = vadd.f32 %v1490_v26, %v1460_v1  ;;  %v1141_v14 = vadd.f32 %v1716_v6, %v2731_v35  ;;  %v1240_v16 = vmax.f32 %v1138_v9, 0.0  ;;  %v1354_v60 = vpop.permute.xlu1 %1353 }
 0x24c   :  { %v1492_v8 = vadd.f32 %v1491_v11, %v1461_v37  ;;  %v1717_v29 = vpop.f32.mrb[12].mxu1  ;;  %v1241_v27 = vmax.f32 %v1141_v14, 0.0  ;;  %v1464_v33 = vmul.f32 %v1339_v17, %v1240_v16 }
 0x24d   :  { %v1718_v18 = vpop.f32.mrb[13].mxu1 }
 0x24e   :  { %v1493_v19 = vadd.f32 %v1492_v8, %v1462_v15  ;;  %v1719_v20 = vadd.f32 %v1718_v18, %v1717_v29  ;;  %v1720_v32 = vpop.f32.mrb[14].mxu1  ;;  %v1465_v35 = vmul.f32 %v1344_v21, %v1241_v27  ;;  %v1364_v6 = vpop.permute.xlu1 %1363 }
 0x24f   :  { %v1721_v40 = vpop.f32.mrb[15].mxu1 }
 0x250   :  { %v1494_v23 = vadd.f32 %v1493_v19, %v1463_v31  ;;  %v1146_v24 = vadd.f32 %v1719_v20, %v2733_v39  ;;  %v1722_v36 = vadd.f32 %v1721_v40, %v1720_v32 }
 0x252   :  { %v1495_v57 = vadd.f32 %v1494_v23, %v1464_v33  ;;  %v1242_v59 = vmax.f32 %v1146_v24, 0.0  ;;  %v1149_v34 = vadd.f32 %v1722_v36, %v2735_v5  ;;  %v1359_v5 = vpop.permute.xlu0 %1358  ;;  %v1374_v27 = vpop.permute.xlu1 %1373 }
 0x254   :  { %v1496_v30 = vadd.f32 %v1495_v57, %v1465_v35  ;;  %v1466_v56 = vmul.f32 %v1349_v7, %v1242_v59  ;;  %v1243_v4 = vmax.f32 %v1149_v34, 0.0  ;;  %v1723_v38 = vpop.f32.mrb[16].mxu1 }
 0x255   :  { %v1724_v58 = vpop.f32.mrb[17].mxu1 }
 0x256   :  { %v1497_v61 = vadd.f32 %v1496_v30, %v1466_v56  ;;  %v1467_v51 = vmul.f32 %v1354_v60, %v1243_v4  ;;  %v1725_v62 = vadd.f32 %v1724_v58, %v1723_v38  ;;  %v1726_v25 = vpop.f32.mrb[18].mxu1  ;;  %v1369_v18 = vpop.permute.xlu0 %1368 }
 0x257   :  { %v1727_v63 = vpop.f32.mrb[19].mxu1  ;;  %v1384_v30 = vpop.permute.xlu1 %1383 }
 0x258   :  { %v1498_v0 = vadd.f32 %v1497_v61, %v1467_v51  ;;  %v1154_v39 = vadd.f32 %v1725_v62, %v2737_v42  ;;  %v1728_v28 = vadd.f32 %v1727_v63, %v1726_v25 }
 0x25a   :  { %v1244_v1 = vmax.f32 %v1154_v39, 0.0  ;;  %v1157_v2 = vadd.f32 %v1728_v28, %v2739_v41  ;;  %v1379_v59 = vpop.permute.xlu0 %1378 }
 0x25c   :  { %v1468_v3 = vmul.f32 %v1359_v5, %v1244_v1  ;;  %v1245_v26 = vmax.f32 %v1157_v2, 0.0  ;;  %v1729_v9 = vpop.f32.mrb[20].mxu1 }
 0x25d   :  { %v1730_v10 = vpop.f32.mrb[21].mxu1 }
 0x25e   :  { %v1499_v37 = vadd.f32 %v1498_v0, %v1468_v3  ;;  %v1469_v11 = vmul.f32 %v1364_v6, %v1245_v26  ;;  %v1731_v12 = vadd.f32 %v1730_v10, %v1729_v9  ;;  %v1732_v14 = vpop.f32.mrb[22].mxu1 }
 0x25f   :  { %v1733_v15 = vpop.f32.mrb[23].mxu1 }
 0x260   :  { %v1500_v8 = vadd.f32 %v1499_v37, %v1469_v11  ;;  %v1162_v16 = vadd.f32 %v1731_v12, %v2741_v43  ;;  %v1734_v29 = vadd.f32 %v1733_v15, %v1732_v14 }
 0x262   :  { %v1246_v42 = vmax.f32 %v1162_v16, 0.0  ;;  %v1165_v17 = vadd.f32 %v1734_v29, %v2743_v44 }
 0x264   :  { %v1470_v41 = vmul.f32 %v1369_v18, %v1246_v42  ;;  %v1247_v31 = vmax.f32 %v1165_v17, 0.0  ;;  %v1735_v19 = vpop.f32.mrb[24].mxu1 }
 0x265   :  { %v1736_v20 = vpop.f32.mrb[25].mxu1 }
 0x266   :  { %v1501_v32 = vadd.f32 %v1500_v8, %v1470_v41  ;;  %v1471_v21 = vmul.f32 %v1374_v27, %v1247_v31  ;;  %v1737_v40 = vadd.f32 %v1736_v20, %v1735_v19  ;;  %v1738_v23 = vpop.f32.mrb[26].mxu1 }
 0x267   :  { %v1739_v33 = vpop.f32.mrb[27].mxu1 }
 0x268   :  { %v1502_v24 = vadd.f32 %v1501_v32, %v1471_v21  ;;  %v1170_v36 = vadd.f32 %v1737_v40, %v2745_v46  ;;  %v1740_v57 = vadd.f32 %v1739_v33, %v1738_v23  ;;  %v1389_v46 = vpop.permute.xlu0 %1388 }
 0x26a   :  { %v1248_v43 = vmax.f32 %v1170_v36, 0.0  ;;  %v1173_v35 = vadd.f32 %v1740_v57, %v2747_v50  ;;  %v1394_v50 = vpop.permute.xlu1 %1393 }
 0x26c   :  { %v1472_v44 = vmul.f32 %v1379_v59, %v1248_v43  ;;  %v1249_v34 = vmax.f32 %v1173_v35, 0.0  ;;  %v1741_v7 = vpop.f32.mrb[28].mxu1  ;;  %v1399_v10 = vpop.permute.xlu0 %1398 }
 0x26d   :  { %v1742_v56 = vpop.f32.mrb[29].mxu1 }
 0x26e   :  { %v1503_v4 = vadd.f32 %v1502_v24, %v1472_v44  ;;  %v1473_v38 = vmul.f32 %v1384_v30, %v1249_v34  ;;  %v1743_v60 = vadd.f32 %v1742_v56, %v1741_v7  ;;  %v1744_v58 = vpop.f32.mrb[30].mxu1  ;;  %v1404_v12 = vpop.permute.xlu1 %1403 }
 0x26f   :  { %v1745_v61 = vpop.f32.mrb[31].mxu1 }
 0x270   :  { %v1504_v51 = vadd.f32 %v1503_v4, %v1473_v38  ;;  %v1178_v62 = vadd.f32 %v1743_v60, %v2749_v13  ;;  %v1746_v25 = vadd.f32 %v1745_v61, %v1744_v58  ;;  %v1409_v42 = vpop.permute.xlu0 %1408 }
 0x272   :  { %v1250_v63 = vmax.f32 %v1178_v62, 0.0  ;;  %v1181_v0 = vadd.f32 %v1746_v25, %v2751_v47  ;;  %v1414_v19 = vpop.permute.xlu1 %1413 }
 0x274   :  { %v1474_v39 = vmul.f32 %v1389_v46, %v1250_v63  ;;  %v1251_v28 = vmax.f32 %v1181_v0, 0.0  ;;  %v1747_v1 = vpop.f32.mrb[32].mxu1  ;;  %v1419_v23 = vpop.permute.xlu0 %1418 }
 0x275   :  { %v1748_v2 = vpop.f32.mrb[33].mxu1 }
 0x276   :  { %v1505_v5 = vadd.f32 %v1504_v51, %v1474_v39  ;;  %v1475_v3 = vmul.f32 %v1394_v50, %v1251_v28  ;;  %v1749_v26 = vadd.f32 %v1748_v2, %v1747_v1  ;;  %v1750_v9 = vpop.f32.mrb[34].mxu1  ;;  %v1424_v36 = vpop.permute.xlu1 %1423 }
 0x277   :  { %v1751_v6 = vpop.f32.mrb[35].mxu1 }
 0x278   :  { %v1506_v37 = vadd.f32 %v1505_v5, %v1475_v3  ;;  %v1186_v11 = vadd.f32 %v1749_v26, %v2753_v45  ;;  %v1752_v13 = vadd.f32 %v1751_v6, %v1750_v9 }
 0x27a   :  { %v1252_v14 = vmax.f32 %v1186_v11, 0.0  ;;  %v1189_v15 = vadd.f32 %v1752_v13, %v2755_v52 }
 0x27c   :  { %v1476_v47 = vmul.f32 %v1399_v10, %v1252_v14  ;;  %v1253_v8 = vmax.f32 %v1189_v15, 0.0  ;;  %v1753_v16 = vpop.f32.mrb[36].mxu1 }
 0x27d   :  { %v1754_v29 = vpop.f32.mrb[37].mxu1 }
 0x27e   :  { %v1507_v17 = vadd.f32 %v1506_v37, %v1476_v47  ;;  %v1477_v18 = vmul.f32 %v1404_v12, %v1253_v8  ;;  %v1755_v41 = vadd.f32 %v1754_v29, %v1753_v16  ;;  %v1756_v31 = vpop.f32.mrb[38].mxu1 }
 0x27f   :  { %v1757_v27 = vpop.f32.mrb[39].mxu1 }
 0x280   :  { %v1508_v20 = vadd.f32 %v1507_v17, %v1477_v18  ;;  %v1194_v32 = vadd.f32 %v1755_v41, %v2757_v48  ;;  %v1758_v45 = vadd.f32 %v1757_v27, %v1756_v31  ;;  %v894_v48 = vpop.permute.xlu0 %893 }
 0x282   :  { %v1254_v21 = vmax.f32 %v1194_v32, 0.0  ;;  %v1197_v40 = vadd.f32 %v1758_v45, %v2759_v53  ;;  %v1429_v53 = vpop.permute.xlu1 %1428 }
 0x284   :  { %v1478_v52 = vmul.f32 %v1409_v42, %v1254_v21  ;;  %v1255_v33 = vmax.f32 %v1197_v40, 0.0  ;;  %v1759_v24 = vpop.f32.mrb[40].mxu1  ;;  %v899_v50 = vpop.permute.xlu0 %898 }
 0x285   :  { %v1760_v57 = vpop.f32.mrb[41].mxu1 }
 0x286   :  { %v1509_v43 = vadd.f32 %v1508_v20, %v1478_v52  ;;  %v1479_v35 = vmul.f32 %v1414_v19, %v1255_v33  ;;  %v1761_v59 = vadd.f32 %v1760_v57, %v1759_v24  ;;  %v1762_v44 = vpop.f32.mrb[42].mxu1  ;;  %v1434_v1 = vpop.permute.xlu1 %1433 }
 0x287   :  { %v1763_v34 = vpop.f32.mrb[43].mxu1 }
 0x288   :  { %v1510_v7 = vadd.f32 %v1509_v43, %v1479_v35  ;;  %v1202_v30 = vadd.f32 %v1761_v59, %v2761_v54  ;;  %v1764_v56 = vadd.f32 %v1763_v34, %v1762_v44  ;;  %v904_v6 = vpop.permute.xlu0 %903 }
 0x28a   :  { %v1256_v4 = vmax.f32 %v1202_v30, 0.0  ;;  %v1205_v38 = vadd.f32 %v1764_v56, %v2763_v22  ;;  %v1439_v12 = vpop.permute.xlu1 %1438 }
 0x28c   :  { %v1480_v60 = vmul.f32 %v1419_v23, %v1256_v4  ;;  %v1257_v58 = vmax.f32 %v1205_v38, 0.0  ;;  %v1765_v61 = vpop.f32.mrb[44].mxu1  ;;  %v909_v29 = vpop.permute.xlu0 %908 }
 0x28d   :  { %v1766_v51 = vpop.f32.mrb[45].mxu1 }
 0x28e   :  { %v1511_v62 = vadd.f32 %v1510_v7, %v1480_v60  ;;  %v1481_v25 = vmul.f32 %v1424_v36, %v1257_v58  ;;  %v1767_v46 = vadd.f32 %v1766_v51, %v1765_v61  ;;  %v1768_v63 = vpop.f32.mrb[46].mxu1  ;;  %v1444_v18 = vpop.permute.xlu1 %1443 }
 0x28f   :  { %v1769_v0 = vpop.f32.mrb[47].mxu1 }
 0x290   :  { %v1512_v39 = vadd.f32 %v1511_v62, %v1481_v25  ;;  %v1210_v28 = vadd.f32 %v1767_v46, %v2765_v55  ;;  %v1770_v54 = vadd.f32 %v1769_v0, %v1768_v63  ;;  %v1449_v33 = vpop.permute.xlu0 %1448 }
 0x292   :  { %v1258_v2 = vmax.f32 %v1210_v28, 0.0  ;;  %v1213_v5 = vadd.f32 %v1770_v54, %v2767_v49  ;;  %v1454_v57 = vpop.permute.xlu1 %1453 }
 0x294   :  { %v1482_v22 = vmul.f32 %v1429_v53, %v1258_v2  ;;  %v1259_v3 = vmax.f32 %v1213_v5, 0.0  ;;  %v1771_v26 = vpop.f32.mrb[48].mxu1 }
 0x295   :  { %v1772_v9 = vpop.f32.mrb[49].mxu1 }
 0x296   :  { %v1513_v10 = vadd.f32 %v1512_v39, %v1482_v22  ;;  %v1483_v37 = vmul.f32 %v1434_v1, %v1259_v3  ;;  %v1773_v11 = vadd.f32 %v1772_v9, %v1771_v26  ;;  %v1774_v13 = vpop.f32.mrb[50].mxu1 }
 0x297   :  { %v1775_v14 = vpop.f32.mrb[51].mxu1 }
 0x298   :  { %v1514_v15 = vadd.f32 %v1513_v10, %v1483_v37  ;;  %v1218_v47 = vadd.f32 %v1773_v11, %v894_v48  ;;  %v1776_v8 = vadd.f32 %v1775_v14, %v1774_v13  ;;  %v1526_v48 = vstv %s2813_s6 }
 0x29a   :  { %v1260_v55 = vmax.f32 %v1218_v47, 0.0  ;;  %v1221_v16 = vadd.f32 %v1776_v8, %v899_v50 }
 0x29c   :  { %v1484_v42 = vmul.f32 %v1439_v12, %v1260_v55  ;;  %v1261_v17 = vmax.f32 %v1221_v16, 0.0  ;;  %v1777_v49 = vpop.f32.mrb[52].mxu1 }
 0x29d   :  { %v1778_v41 = vpop.f32.mrb[53].mxu1 }
 0x29e   :  { %v1515_v31 = vadd.f32 %v1514_v15, %v1484_v42  ;;  %v1485_v19 = vmul.f32 %v1444_v18, %v1261_v17  ;;  %v1779_v27 = vadd.f32 %v1778_v41, %v1777_v49  ;;  %v1780_v20 = vpop.f32.mrb[54].mxu1 }
 0x29f   :  { %v1781_v32 = vpop.f32.mrb[55].mxu1 }
 0x2a0   :  { %v1516_v45 = vadd.f32 %v1515_v31, %v1485_v19  ;;  %v1226_v21 = vadd.f32 %v1779_v27, %v904_v6  ;;  %v1782_v40 = vadd.f32 %v1781_v32, %v1780_v20 }
 0x2a2   :  { %v1262_v23 = vmax.f32 %v1226_v21, 0.0  ;;  %v1229_v52 = vadd.f32 %v1782_v40, %v909_v29 }
 0x2a4   :  { %v1486_v24 = vmul.f32 %v1449_v33, %v1262_v23  ;;  %v1263_v36 = vmax.f32 %v1229_v52, 0.0 }
 0x2a6   :  { %v1517_v43 = vadd.f32 %v1516_v45, %v1486_v24  ;;  %v1487_v35 = vmul.f32 %v1454_v57, %v1263_v36 }
 0x2a8   :  { %v1518_v59 = vadd.f32 %v1517_v43, %v1487_v35 }
 0x2aa   :  { %v1519_v44 = vrot.slane %v1518_v59, 4 }
 0x2ac   :  { %v1520_v34 = vadd.f32 %v1519_v44, %v1518_v59 }
 0x2ae   :  { %v1521_v7 = vrot.slane %v1520_v34, 2 }
 0x2b0   :  { %v1522_v30 = vadd.f32 %v1521_v7, %v1520_v34 }
 0x2b2   :  { %v1523_v56 = vrot.slane %v1522_v30, 1 }
 0x2b4   :  { %v1524_v4 = vadd.f32 %v1523_v56, %v1522_v30 }
 0x2b6   :  { %v1527_v38 = vadd.f32 %v1526_v48, %v1524_v4 }
 0x2b8   :  { %1528 = vst [vmem:[#allocation3] sm:$0x1] %v1527_v38 }
 0x2b9   :  { %1990 = shalt.err (!%p1987_p4)
}
 0x2ba   :  { %s1991_s29 = scalar_lea.hbm %s2814_s7, 16 }
 0x2bb   :  { %p1992_p5 = scmp.ne.s32.totalorder %s2814_s7, %s1991_s29  ;;  %p1995_p6 = scmp.lt.u32.totalorder %s1991_s29, %s2814_s7 }
 0x2bd   :  { %p1997_p7 = pnand %p1995_p6, %p1992_p5 }
 0x2bf   :  { %2000 = shalt.err (!%p1997_p7)
}
 0x2c0   :  { %1538 = dma.vmem_to_hbm [thread:$0]  %s1536_s24, 16, %s2814_s7, [#allocation4]  }
 0x2c1   :  { %2001 = dma.done.wait [#allocation4], 16  }
 0x2c2   :  { %2002 = vsyncadd [#allocation4], 4294967280 }
 0x2c3   :  { %1542 = vsyncpa [#allocation4], 1 }

</bundles_post_ra>
